<compile_context>
chip_gen: v6e
topology: v6e:2x2x1
jax: 0.10.0
libtpu: 0.0.40
codegen_flags: <defaults>
</compile_context>

<pallas_src>
import jax
import jax.numpy as jnp
from jax.experimental import pallas as pl
from jax.experimental.pallas import tpu as pltpu

# ----- hyper-parameters implied by MultiheadAttention.__init__ ---------------
N_CH = 7            # conv in/out channels == attention sequence length N
N_PAD = 8           # N padded to a sublane multiple inside the kernel
KH = KW = 12        # conv kernel / stride (exactly covers the spatial dims)
D_MODEL = 32        # d_model (last dim of v)
N_HEAD = 2          # two parallel q/k/v branches, concatenated before fc
OUT_DIM = 16        # output_dim of the final fc

TEMPERATURE = float(D_MODEL) ** 0.5

# TODO(synk): nn.Dropout is treated as identity (eval mode); training-mode
#             stochastic dropout is not implemented.
# TODO(synk): only the mask=None path of forward() is implemented.
# TODO(synk): the grouped Conv3d q/k projection is folded into a wrapper-side
#             einsum (per the perf review) rather than done inside the kernel.
# TODO(synk): v5e-specific tweaks (bf16 kernel output to halve the store
#             stream; densifying the 12x-redundant kron weight) are noted but
#             not specialized per chip here.


def _mha_kernel(qk_ref, v_ref, w_ref, b_ref, o_ref):
    """One batch-tile of fused two-head attention.

    qk_ref : (bt, 2*H, N_PAD, S)   bf16  [q_head0, q_head1, k_head0, k_head1]
    v_ref  : (bt, N_PAD, TC*D)     bf16  values, (t, c, d) flattened on lanes
    w_ref  : (H, TC*D, TC*O)       bf16  per-head kron(I_TC, (Wfc_h @ Wv_h)^T)
    b_ref  : (1, TC*O)             f32   fc bias tiled over (t, c)
    o_ref  : (bt, N_PAD, TC*O)     f32
    """
    bt = qk_ref.shape[0]
    s = qk_ref.shape[-1]
    inv_temp = 1.0 / TEMPERATURE

    qk = qk_ref[...]                                         # (bt, 4, 8, S)
    # heads folded into the batch dim; leading-dim reshapes are layout-free
    qh = qk[:, :N_HEAD].reshape(bt * N_HEAD, N_PAD, s)
    kh = qk[:, N_HEAD:].reshape(bt * N_HEAD, N_PAD, s)

    # ---- scores + softmax for BOTH heads in one batched pass ---------------
    sc = jnp.einsum('bns,bms->bnm', qh, kh,
                    preferred_element_type=jnp.float32) * inv_temp
    # mask the zero-padded key column (N_CH .. N_PAD-1)
    col = jax.lax.broadcasted_iota(jnp.int32, (N_PAD, N_PAD), 1)
    sc = sc + jnp.where(col < N_CH, 0.0, -1e9).astype(jnp.float32)
    sc = sc - jnp.max(sc, axis=-1, keepdims=True)
    e = jnp.exp(sc)
    inv_den = pl.reciprocal(jnp.sum(e, axis=-1, keepdims=True), approx=True)
    p = (e * inv_den).astype(jnp.bfloat16)
    p = p.reshape(bt, N_HEAD, N_PAD, N_PAD)                  # (bt, 2, 8, 8)

    v3 = v_ref[...]                                          # (bt, 8, TC*D)

    # ---- attention mix per head (batched over the tile) --------------------
    pv0 = jnp.einsum('bst,btd->bsd', p[:, 0], v3,
                     preferred_element_type=jnp.float32).astype(jnp.bfloat16)
    pv1 = jnp.einsum('bst,btd->bsd', p[:, 1], v3,
                     preferred_element_type=jnp.float32).astype(jnp.bfloat16)

    # ---- composed (value-proj o fc) matmul per head -------------------------
    # Done directly on the 3-D tiles (contract the last dim): no concat and no
    # (bt*N, .) reshape relayout.  N_PAD=8 keeps the (bt, 8) fold free.
    res = (jnp.einsum('bsd,de->bse', pv0, w_ref[0],
                      preferred_element_type=jnp.float32)
           + jnp.einsum('bsd,de->bse', pv1, w_ref[1],
                        preferred_element_type=jnp.float32))
    o_ref[...] = (res + b_ref[...]).astype(o_ref.dtype)


def _pick_b_tile(batch, cap=256, align=8):
    """Batch-tile size.

    Large batches use ~`cap` rows per step (the per-step VMEM footprint at 256
    rows is only ~8 MB, far below the scoped-VMEM budget on v5e/v6e/v7x), with
    the batch padded up to a multiple of the tile by the caller -- never a
    degenerate tiny divisor.  Mid-size batches keep >= 2 grid steps so the
    "parallel" grid axis can be sharded across v7x's two TensorCores.
    """
    if batch <= cap:
        if batch >= 16 and batch % 2 == 0:
            return batch // 2
        return batch
    steps = -(-batch // cap)            # ceil
    bt = -(-batch // steps)             # ceil -> balanced tiles
    return -(-bt // align) * align      # round up to a sublane multiple


@jax.jit
def multihead_attention(q, k, v, params):
    """q, k: (B, 7, 12, 12, S) NCDHW;  v: (B, 7, T, C, D).  Returns (B, 7, T, C, OUT_DIM)."""
    B, N, T, C, D = v.shape
    S = q.shape[-1]
    K = KH * KW
    TC = T * C
    O = OUT_DIM

    f32, bf16 = jnp.float32, jnp.bfloat16

    # ---- grouped Conv3d == per-channel contraction over the 12x12 window ----
    # q4/k4 (the largest HBM reads of the whole op) are each read ONCE, with
    # both heads' weights stacked.
    q4 = q.reshape(B, N, K, S).astype(f32)
    k4 = k.reshape(B, N, K, S).astype(f32)
    wq = jnp.stack([params['wq0'], params['wq1']])           # (2, N, K)
    wk = jnp.stack([params['wk0'], params['wk1']])
    qp = jnp.einsum('bnks,hnk->bhns', q4, wq)                # (B, 2, N, S)
    kp = jnp.einsum('bnks,hnk->bhns', k4, wk)                # (B, 2, N, S)
    # one combined, sublane-padded input stream: [q0, q1, k0, k1]
    qk = jnp.concatenate([qp, kp], axis=1)                   # (B, 4, N, S)
    qk = jnp.pad(qk, ((0, 0), (0, 0), (0, N_PAD - N), (0, 0))).astype(bf16)

    v3 = jnp.pad(v.reshape(B, N, TC * D),
                 ((0, 0), (0, N_PAD - N), (0, 0))).astype(bf16)

    # ---- precomposed (value-proj o fc) weights, one (384, 192) per head -----
    wc0 = (params['wfc'][:, :D] @ params['wv0']).T           # (D, O)
    wc1 = (params['wfc'][:, D:] @ params['wv1']).T           # (D, O)
    eye_tc = jnp.eye(TC, dtype=f32)
    wstack = jnp.stack([jnp.kron(eye_tc, wc0),
                        jnp.kron(eye_tc, wc1)]).astype(bf16)  # (2, TC*D, TC*O)
    bias = jnp.tile(params['bfc'], TC).reshape(1, TC * O).astype(f32)

    # ---- batch tiling (pad awkward batch sizes up to a multiple of bt) ------
    bt = _pick_b_tile(B)
    b_pad = -(-B // bt) * bt
    if b_pad != B:
        pb = b_pad - B
        qk = jnp.pad(qk, ((0, pb), (0, 0), (0, 0), (0, 0)))
        v3 = jnp.pad(v3, ((0, pb), (0, 0), (0, 0)))
    grid = (b_pad // bt,)

    grid_spec = pltpu.PrefetchScalarGridSpec(
        num_scalar_prefetch=0,
        grid=grid,
        in_specs=[
            pl.BlockSpec((bt, 2 * N_HEAD, N_PAD, S), lambda i: (i, 0, 0, 0)),
            pl.BlockSpec((bt, N_PAD, TC * D), lambda i: (i, 0, 0)),
            # constant index_maps -> fetched once, not re-DMAed per step
            # (pipeline_mode=pl.Buffered(1) would also drop the spare buffer,
            #  but VMEM headroom is ample so it is omitted for portability)
            pl.BlockSpec((N_HEAD, TC * D, TC * O), lambda i: (0, 0, 0)),
            pl.BlockSpec((1, TC * O), lambda i: (0, 0)),
        ],
        out_specs=pl.BlockSpec((bt, N_PAD, TC * O), lambda i: (i, 0, 0)),
    )

    out = pl.pallas_call(
        _mha_kernel,
        out_shape=jax.ShapeDtypeStruct((b_pad, N_PAD, TC * O), jnp.float32),
        grid_spec=grid_spec,
        compiler_params=pltpu.CompilerParams(
            dimension_semantics=("parallel",),
            vmem_limit_bytes=32 * 1024 * 1024),
    )(qk, v3, wstack, bias)

    return out[:B, :N].reshape(B, N, T, C, O)


def reference(q, k, v, params):
    """Pure-JAX f32 reference reproducing the PyTorch forward (eval mode, mask=None)."""
    B, N, T, C, D = v.shape

    def conv_proj(x, w):
        x2 = x.reshape(B, N, KH * KW, x.shape[-1])
        return jnp.einsum('bnks,nk->bns', x2, w)

    def head(wq, wk, wv):
        q0 = conv_proj(q, wq) / TEMPERATURE
        k0 = conv_proj(k, wk)
        attn = jnp.einsum('bns,bms->bnm', q0, k0)
        p = jax.nn.softmax(attn, axis=-1)
        v0 = jnp.einsum('btnmd,ed->btnme', v, wv)
        return jnp.einsum('bst,btnmd->bsnmd', p, v0)

    out0 = head(params['wq0'], params['wk0'], params['wv0'])
    out1 = head(params['wq1'], params['wk1'], params['wv1'])
    cat = jnp.concatenate([out0, out1], axis=-1)
    return jnp.einsum('bsnmd,od->bsnmo', cat, params['wfc']) + params['bfc']


if __name__ == "__main__":
    B, T, C, S = 2, 3, 4, 5

    key = jax.random.PRNGKey(0)
    ks = jax.random.split(key, 12)

    q = jax.random.normal(ks[0], (B, N_CH, KH, KW, S), jnp.float32)
    k_in = jax.random.normal(ks[1], (B, N_CH, KH, KW, S), jnp.float32)
    v = jax.random.normal(ks[2], (B, N_CH, T, C, D_MODEL), jnp.float32)

    params = {
        "wq0": 0.1 * jax.random.normal(ks[3], (N_CH, KH * KW), jnp.float32),
        "wk0": 0.1 * jax.random.normal(ks[4], (N_CH, KH * KW), jnp.float32),
        "wq1": 0.1 * jax.random.normal(ks[5], (N_CH, KH * KW), jnp.float32),
        "wk1": 0.1 * jax.random.normal(ks[6], (N_CH, KH * KW), jnp.float32),
        "wv0": 0.1 * jax.random.normal(ks[7], (D_MODEL, D_MODEL), jnp.float32),
        "wv1": 0.1 * jax.random.normal(ks[8], (D_MODEL, D_MODEL), jnp.float32),
        "wfc": 0.1 * jax.random.normal(ks[9], (OUT_DIM, N_HEAD * D_MODEL), jnp.float32),
        "bfc": 0.1 * jax.random.normal(ks[10], (OUT_DIM,), jnp.float32),
    }

    out = multihead_attention(q, k_in, v, params)
    out = jax.block_until_ready(out)

    ref = reference(q, k_in, v, params)
    assert out.shape == (B, N_CH, T, C, OUT_DIM)
    assert jnp.allclose(out, ref, rtol=5e-2, atol=5e-2)
    print("KERNEL_OK")
</pallas_src>

<mosaic_0001>
module attributes {stable_mosaic.version = 11 : i64} {
  func.func @_mha_kernel(%arg0: i32, %arg1: memref<2x4x8x5xbf16, #tpu.memory_space<vmem>>, %arg2: memref<2x8x384xbf16, #tpu.memory_space<vmem>>, %arg3: memref<2x384x192xbf16, #tpu.memory_space<vmem>>, %arg4: memref<1x192xf32, #tpu.memory_space<vmem>>, %arg5: memref<2x8x192xf32, #tpu.memory_space<vmem>>) attributes {dimension_semantics = [#tpu.dimension_semantics<parallel>], iteration_bounds = array<i64: 1>, scalar_prefetch = 0 : i64, scratch_operands = 0 : i64, tpu.core_type = #tpu.core_type<tc>, window_params = [{transform_indices = @transform_0, window_bounds = array<i64: 2, 4, 8, 5>}, {transform_indices = @transform_1, window_bounds = array<i64: 2, 8, 384>}, {pipeline_mode = #tpu.pipeline_mode<synchronous>, transform_indices = @transform_2, window_bounds = array<i64: 2, 384, 192>}, {pipeline_mode = #tpu.pipeline_mode<synchronous>, transform_indices = @transform_3, window_bounds = array<i64: 1, 192>}, {transform_indices = @transform_4, window_bounds = array<i64: 2, 8, 192>}]} {
    %c0 = arith.constant 0 : index
    %c0_0 = arith.constant 0 : index
    %c0_1 = arith.constant 0 : index
    %c0_2 = arith.constant 0 : index
    %0 = vector.load %arg1[%c0, %c0_0, %c0_1, %c0_2] : memref<2x4x8x5xbf16, #tpu.memory_space<vmem>>, vector<2x4x8x5xbf16>
    %1 = vector.extract_strided_slice %0 {offsets = [0, 0, 0, 0], sizes = [2, 2, 8, 5], strides = [1, 1, 1, 1]} : vector<2x4x8x5xbf16> to vector<2x2x8x5xbf16>
    %2 = vector.shape_cast %1 : vector<2x2x8x5xbf16> to vector<4x8x5xbf16>
    %3 = vector.extract_strided_slice %0 {offsets = [0, 2, 0, 0], sizes = [2, 2, 8, 5], strides = [1, 1, 1, 1]} : vector<2x4x8x5xbf16> to vector<2x2x8x5xbf16>
    %4 = vector.shape_cast %3 : vector<2x2x8x5xbf16> to vector<4x8x5xbf16>
    "tpu.trace_start"() <{level = 10 : i32, message = "bns,bms->bnm"}> : () -> ()
    %cst = arith.constant dense<0.000000e+00> : vector<4x8x8xf32>
    %5 = tpu.matmul %2, %4, %cst {dimension_numbers = #tpu.dot_dimension_numbers<[2], [2], [1], [1], [0, 0, 0, 1, 1, 1], [0], [0]>} : vector<4x8x5xbf16>, vector<4x8x5xbf16>, vector<4x8x8xf32> -> vector<4x8x8xf32>
    "tpu.trace_stop"() : () -> ()
    %cst_3 = arith.constant 0.176776692 : f32
    %6 = vector.broadcast %cst_3 : f32 to vector<4x8x8xf32>
    %7 = arith.mulf %5, %6 : vector<4x8x8xf32>
    %8 = tpu.iota {dimensions = array<i32: 1>} : vector<8x8xi32>
    %c7_i32 = arith.constant 7 : i32
    %9 = vector.broadcast %c7_i32 : i32 to vector<8x8xi32>
    %10 = arith.cmpi slt, %8, %9 : vector<8x8xi32>
    %cst_4 = arith.constant 0.000000e+00 : f32
    %cst_5 = arith.constant -1.000000e+09 : f32
    %11 = vector.broadcast %cst_4 : f32 to vector<8x8xf32>
    %12 = vector.broadcast %cst_5 : f32 to vector<8x8xf32>
    %13 = arith.select %10, %11, %12 : vector<8x8xi1>, vector<8x8xf32>
    %14 = vector.shape_cast %13 : vector<8x8xf32> to vector<1x8x8xf32>
    %15 = vector.broadcast %14 : vector<1x8x8xf32> to vector<4x8x8xf32>
    %16 = arith.addf %7, %15 : vector<4x8x8xf32>
    %cst_6 = arith.constant dense<0xFF800000> : vector<4x8xf32>
    %17 = vector.multi_reduction <maximumf>, %16, %cst_6 [2] : vector<4x8x8xf32> to vector<4x8xf32>
    %18 = vector.shape_cast %17 : vector<4x8xf32> to vector<4x8x1xf32>
    %19 = vector.broadcast %18 : vector<4x8x1xf32> to vector<4x8x8xf32>
    %20 = arith.subf %16, %19 : vector<4x8x8xf32>
    %21 = math.exp %20 : vector<4x8x8xf32>
    %cst_7 = arith.constant dense<0.000000e+00> : vector<4x8xf32>
    %22 = vector.multi_reduction <add>, %21, %cst_7 [2] : vector<4x8x8xf32> to vector<4x8xf32>
    %23 = vector.shape_cast %22 : vector<4x8xf32> to vector<4x8x1xf32>
    %24 = tpu.reciprocal %23 {approx = true} : vector<4x8x1xf32> -> vector<4x8x1xf32>
    %25 = vector.broadcast %24 : vector<4x8x1xf32> to vector<4x8x8xf32>
    %26 = arith.mulf %21, %25 : vector<4x8x8xf32>
    %27 = arith.truncf %26 : vector<4x8x8xf32> to vector<4x8x8xbf16>
    %28 = vector.shape_cast %27 : vector<4x8x8xbf16> to vector<2x2x8x8xbf16>
    %c0_8 = arith.constant 0 : index
    %c0_9 = arith.constant 0 : index
    %c0_10 = arith.constant 0 : index
    %29 = vector.load %arg2[%c0_8, %c0_9, %c0_10] : memref<2x8x384xbf16, #tpu.memory_space<vmem>>, vector<2x8x384xbf16>
    %30 = vector.extract_strided_slice %28 {offsets = [0, 0, 0, 0], sizes = [2, 1, 8, 8], strides = [1, 1, 1, 1]} : vector<2x2x8x8xbf16> to vector<2x1x8x8xbf16>
    %31 = vector.shape_cast %30 : vector<2x1x8x8xbf16> to vector<2x8x8xbf16>
    "tpu.trace_start"() <{level = 10 : i32, message = "bst,btd->bsd"}> : () -> ()
    %cst_11 = arith.constant dense<0.000000e+00> : vector<2x8x384xf32>
    %32 = tpu.matmul %31, %29, %cst_11 {dimension_numbers = #tpu.dot_dimension_numbers<[2], [1], [1], [2], [0, 0, 0, 1, 1, 2], [0], [0]>} : vector<2x8x8xbf16>, vector<2x8x384xbf16>, vector<2x8x384xf32> -> vector<2x8x384xf32>
    "tpu.trace_stop"() : () -> ()
    %33 = arith.truncf %32 : vector<2x8x384xf32> to vector<2x8x384xbf16>
    %34 = vector.extract_strided_slice %28 {offsets = [0, 1, 0, 0], sizes = [2, 1, 8, 8], strides = [1, 1, 1, 1]} : vector<2x2x8x8xbf16> to vector<2x1x8x8xbf16>
    %35 = vector.shape_cast %34 : vector<2x1x8x8xbf16> to vector<2x8x8xbf16>
    "tpu.trace_start"() <{level = 10 : i32, message = "bst,btd->bsd"}> : () -> ()
    %cst_12 = arith.constant dense<0.000000e+00> : vector<2x8x384xf32>
    %36 = tpu.matmul %35, %29, %cst_12 {dimension_numbers = #tpu.dot_dimension_numbers<[2], [1], [1], [2], [0, 0, 0, 1, 1, 2], [0], [0]>} : vector<2x8x8xbf16>, vector<2x8x384xbf16>, vector<2x8x384xf32> -> vector<2x8x384xf32>
    "tpu.trace_stop"() : () -> ()
    %37 = arith.truncf %36 : vector<2x8x384xf32> to vector<2x8x384xbf16>
    %c0_13 = arith.constant 0 : index
    %c0_14 = arith.constant 0 : index
    %c0_15 = arith.constant 0 : index
    %38 = vector.load %arg3[%c0_13, %c0_14, %c0_15] : memref<2x384x192xbf16, #tpu.memory_space<vmem>>, vector<1x384x192xbf16>
    %39 = vector.shape_cast %38 : vector<1x384x192xbf16> to vector<384x192xbf16>
    "tpu.trace_start"() <{level = 10 : i32, message = "bsd,de->bse"}> : () -> ()
    %cst_16 = arith.constant dense<0.000000e+00> : vector<2x8x192xf32>
    %40 = tpu.matmul %33, %39, %cst_16 {dimension_numbers = #tpu.dot_dimension_numbers<[2], [0], [0, 1], [1], [0, 0, 0, 1, 1, 1], [], []>} : vector<2x8x384xbf16>, vector<384x192xbf16>, vector<2x8x192xf32> -> vector<2x8x192xf32>
    "tpu.trace_stop"() : () -> ()
    %c1 = arith.constant 1 : index
    %c0_17 = arith.constant 0 : index
    %c0_18 = arith.constant 0 : index
    %41 = vector.load %arg3[%c1, %c0_17, %c0_18] : memref<2x384x192xbf16, #tpu.memory_space<vmem>>, vector<1x384x192xbf16>
    %42 = vector.shape_cast %41 : vector<1x384x192xbf16> to vector<384x192xbf16>
    "tpu.trace_start"() <{level = 10 : i32, message = "bsd,de->bse"}> : () -> ()
    %cst_19 = arith.constant dense<0.000000e+00> : vector<2x8x192xf32>
    %43 = tpu.matmul %37, %42, %cst_19 {dimension_numbers = #tpu.dot_dimension_numbers<[2], [0], [0, 1], [1], [0, 0, 0, 1, 1, 1], [], []>} : vector<2x8x384xbf16>, vector<384x192xbf16>, vector<2x8x192xf32> -> vector<2x8x192xf32>
    "tpu.trace_stop"() : () -> ()
    %44 = arith.addf %40, %43 : vector<2x8x192xf32>
    %c0_20 = arith.constant 0 : index
    %c0_21 = arith.constant 0 : index
    %45 = vector.load %arg4[%c0_20, %c0_21] : memref<1x192xf32, #tpu.memory_space<vmem>>, vector<1x192xf32>
    %46 = vector.shape_cast %45 : vector<1x192xf32> to vector<1x1x192xf32>
    %47 = vector.broadcast %46 : vector<1x1x192xf32> to vector<2x8x192xf32>
    %48 = arith.addf %44, %47 : vector<2x8x192xf32>
    %c0_22 = arith.constant 0 : index
    %c0_23 = arith.constant 0 : index
    %c0_24 = arith.constant 0 : index
    %49 = vector.load %arg5[%c0_22, %c0_23, %c0_24] : memref<2x8x192xf32, #tpu.memory_space<vmem>>, vector<2x8x192xf32>
    tpu.vector_store %arg5[%c0_22, %c0_23, %c0_24], %48 {strides = array<i32>} : memref<2x8x192xf32, #tpu.memory_space<vmem>>, vector<2x8x192xf32>,
    return
  }
  func.func @transform_0(%arg0: i32) -> (i32, i32, i32, i32) {
    %c0_i32 = arith.constant 0 : i32
    %c0_i32_0 = arith.constant 0 : i32
    %c0_i32_1 = arith.constant 0 : i32
    %c0_i32_2 = arith.constant 0 : i32
    return %arg0, %c0_i32, %c0_i32_0, %c0_i32_1 : i32, i32, i32, i32
  }
  func.func @transform_1(%arg0: i32) -> (i32, i32, i32) {
    %c0_i32 = arith.constant 0 : i32
    %c0_i32_0 = arith.constant 0 : i32
    %c0_i32_1 = arith.constant 0 : i32
    return %arg0, %c0_i32, %c0_i32_0 : i32, i32, i32
  }
  func.func @transform_2(%arg0: i32) -> (i32, i32, i32) {
    %c0_i32 = arith.constant 0 : i32
    %c0_i32_0 = arith.constant 0 : i32
    %c0_i32_1 = arith.constant 0 : i32
    %c0_i32_2 = arith.constant 0 : i32
    return %c0_i32, %c0_i32_0, %c0_i32_1 : i32, i32, i32
  }
  func.func @transform_3(%arg0: i32) -> (i32, i32) {
    %c0_i32 = arith.constant 0 : i32
    %c0_i32_0 = arith.constant 0 : i32
    %c0_i32_1 = arith.constant 0 : i32
    return %c0_i32, %c0_i32_0 : i32, i32
  }
  func.func @transform_4(%arg0: i32) -> (i32, i32, i32) {
    %c0_i32 = arith.constant 0 : i32
    %c0_i32_0 = arith.constant 0 : i32
    %c0_i32_1 = arith.constant 0 : i32
    return %arg0, %c0_i32, %c0_i32_0 : i32, i32, i32
  }
}

</mosaic_0001>

<bundles_post_ra>
// kernel: tile.8
= control target key start
LH: loop header
LB: loop body
LE: loop exit
PB: predicated region body
PF: predicated region fallthrough
CT: control target
= control target key end

     0   :  { %s28_s0 = inlined_call_operand.vmem [shape: f32[16], index: 0, kind: input, shape index: {}]   ;;  %s29_s1 = inlined_call_operand.vmem [shape: f32[12,16], index: 1, kind: output, shape index: {}]  }
   0x1   :  { %v4_v0 = vld [vmem:[%s28_s0] ss:$0 sm:$0xff] }
   0x2   :  { %5 = vst [vmem:[%s29_s1] sm:$0xff] %v4_v0  ;;  %8 = vst [vmem:[%s29_s1 + $0x8] sm:$0xff] %v4_v0 }

// kernel: tile.9
= control target key start
LH: loop header
LB: loop body
LE: loop exit
PB: predicated region body
PF: predicated region fallthrough
CT: control target
= control target key end

     0   :  { %s80_s10 = smov 112   ;;  %s81_s11 = smov 80   ;;  %vm4_vm0 = vcmask 130048   ;;  %vm10_vm1 = vcmask 1048448   ;;  %vm16_vm2 = vcmask 917248   ;;  %vm22_vm3 = vcmask 786048   ;;  %s127_s0 = inlined_call_operand.vmem [shape: f32[12,16], index: 0, kind: input, shape index: {}]   ;;  %s128_s1 = inlined_call_operand.vmem [shape: f32[1,192], index: 1, kind: output, shape index: {}]  }
   0x1   :  { %v65_v0 = vld [vmem:[%s127_s0 + $0x7] sm:$0x1]   ;;  %v67_v1 = vld [vmem:[%s127_s0 + $0x5] sm:$0x1]   ;;  %v66_v2 = vld [vmem:[%s127_s0 + $0x6] sm:$0x1]  }
   0x2   :  { %8 = vrot.lane.b32.xlu0 %v65_v0, %s80_s10  ;;  %20 = vrot.lane.b32.xlu1 %v67_v1, %s81_s11  ;;  %v68_v3 = vld [vmem:[%s127_s0 + $0x4] sm:$0x1]   ;;  %s31_s16 = smov 3  ;;  %s38_s17 = smov 3  ;;  %vm28_vm4 = vcmask 654848   ;;  %vm35_vm5 = vcmask 523648  }
   0x3   :  { %s82_s18 = smov 96   ;;  %s83_s19 = smov 64   ;;  %v69_v4 = vld [vmem:[%s127_s0 + $0x3] ss:$8 sm:%s31_s16]   ;;  %v70_v5 = vld [vmem:[%s127_s0 + $0x2] ss:$8 sm:%s38_s17]  }
   0x4   :  { %s2_s22 = smov 3  ;;  %s45_s27 = smov 3  ;;  %vm42_vm6 = vcmask 392448   ;;  %vm49_vm7 = vcmask 261248  }
   0x5   :  { %v3_v6 = vld [vmem:[%s127_s0] ss:$8 sm:%s2_s22]   ;;  %s84_s28 = smov 48   ;;  %s85_s29 = smov 32   ;;  %v71_v7 = vld [vmem:[%s127_s0 + $0x1] ss:$8 sm:%s45_s27]  }
   0x6   :  { %14 = vrot.lane.b32.xlu0 %v66_v2, %s82_s18  ;;  %26 = vrot.lane.b32.xlu1 %v68_v3, %s83_s19  ;;  %5 = vst.msk [vmem:[#allocation0] ss:$8 sm:$0x3] %vm4_vm0, %v3_v6   ;;  %s86_s0 = smov 16  }
   0xa   :  { %33 = vrot.lane.b32.xlu0 %v69_v4, %s84_s28  ;;  %40 = vrot.lane.b32.xlu1 %v70_v5, %s85_s29 }
   0xe   :  { %47 = vrot.lane.b32.xlu0 %v71_v7, %s86_s0 }
  0x74   :  { %v9_v8 = vpop.permute.xlu0 %8   ;;  %v21_v9 = vpop.permute.xlu1 %20  }
  0x75   :  { %11 = vst.msk [vmem:[#allocation0] sm:$0x1] %vm10_vm1, %v9_v8  }
  0x78   :  { %v15_v10 = vpop.permute.xlu0 %14   ;;  %v27_v11 = vpop.permute.xlu1 %26  }
  0x79   :  { %17 = vst.msk [vmem:[#allocation0] sm:$0x1] %vm16_vm2, %v15_v10  }
  0x7a   :  { %23 = vst.msk [vmem:[#allocation0] sm:$0x1] %vm22_vm3, %v21_v9  }
  0x7b   :  { %29 = vst.msk [vmem:[#allocation0] sm:$0x1] %vm28_vm4, %v27_v11  }
  0x7c   :  { %v34_v12 = vpop.permute.xlu0 %33   ;;  %v41_v13 = vpop.permute.xlu1 %40  }
  0x7d   :  { %36 = vst.msk [vmem:[#allocation0] ss:$8 sm:$0x3] %vm35_vm5, %v34_v12  }
  0x7e   :  { %43 = vst.msk [vmem:[#allocation0] ss:$8 sm:$0x3] %vm42_vm6, %v41_v13  }
  0x80   :  { %v48_v14 = vpop.permute.xlu0 %47  }
  0x81   :  { %50 = vst.msk [vmem:[#allocation0] ss:$8 sm:$0x3] %vm49_vm7, %v48_v14  }
  0x88   :  { %v55_v15 = vld [vmem:[#allocation0] sm:$0x1]  ;;  %v60_v16 = vld [vmem:[#allocation0 + $0x8] sm:$0x1] }
  0x89   :  { %58 = vst [vmem:[%s128_s1] sm:$0x1] %v55_v15  ;;  %72 = vst [vmem:[%s128_s1 + $0x1] sm:$0x1] %v60_v16 }

// kernel: multihead_attention.1
= control target key start
LH: loop header
LB: loop body
LE: loop exit
PB: predicated region body
PF: predicated region fallthrough
CT: control target
= control target key end

     0   :  { %vm26_vm0 = vcmask 39936   ;;  %v1881_v0 = vmov 0.0   ;;  %vm1882_vm1 = vmmov 0   ;;  %v215_v13 = vlaneseq  ;;  %s2332_s0 = inlined_call_operand.vmem [shape: bf16[2,4,8,5], index: 0, kind: input, shape index: {}]   ;;  %s2333_s1 = inlined_call_operand.vmem [shape: bf16[2,8,384], index: 1, kind: input, shape index: {}]   ;;  %s2334_s2 = inlined_call_operand.vmem [shape: bf16[2,384,192], index: 2, kind: input, shape index: {}]   ;;  %s2335_s3 = inlined_call_operand.vmem [shape: f32[1,192], index: 3, kind: input, shape index: {}]   ;;  %s2336_s4 = inlined_call_operand.vmem [shape: f32[2,8,192], index: 4, kind: output, shape index: {}]  }
   0x1   :  { %1663 = vmatprep.subr.bf16.mxu0 %v1881_v0  ;;  %1669 = vmatprep.subr.bf16.mxu1 %v1881_v0  ;;  %v20_v1 = vld [vmem:[%s2332_s0 + $0x8] sm:$0xf]  ;;  %v21_v2 = vld [vmem:[%s2332_s0 + $0xc] sm:$0xf]  ;;  %v24_v5 = vld [vmem:[%s2332_s0 + $0x18] sm:$0xf] }
   0x2   :  { %v31_v3 = vsel %vm26_vm0, %v20_v1, 0  ;;  %v77_v4 = vsel %vm26_vm0, %v21_v2, 0  ;;  %1665 = vmatprep.mubr.msk.bf16.mxu0 %vm1882_vm1, %v1881_v0  ;;  %1671 = vmatprep.mubr.msk.bf16.mxu1 %vm1882_vm1, %v1881_v0  ;;  %v25_v6 = vld [vmem:[%s2332_s0 + $0x1c] sm:$0xf]  ;;  %v18_v7 = vld [vmem:[%s2332_s0] sm:$0xf] }
   0x3   :  { %1664 = vmatpush3.bf16.xpose.msra.mxu0 %v31_v3  ;;  %1670 = vmatpush3.bf16.xpose.msra.mxu1 %v77_v4  ;;  %v19_v8 = vld [vmem:[%s2332_s0 + $0x4] sm:$0xf]  ;;  %v123_v9 = vsel %vm26_vm0, %v24_v5, 0  ;;  %v169_v10 = vsel %vm26_vm0, %v25_v6, 0  ;;  %v22_v11 = vld [vmem:[%s2332_s0 + $0x10] sm:$0xf] }
   0x4   :  { %1675 = vmatprep.subr.bf16.mxu0 %v1881_v0  ;;  %1681 = vmatprep.subr.bf16.mxu1 %v1881_v0  ;;  %v23_v12 = vld [vmem:[%s2332_s0 + $0x14] sm:$0xf]  ;;  %v216_v14 = vand.u32 127, %v215_v13  ;;  %v1883_v17 = vmov -1e+09   ;;  %vm223_vm3 = vcmask 64512  }
   0x5   :  { %vm287_vm4 = vcmask 1043456   ;;  %v1715_v2 = vld [vmem:[%s2333_s1 + $0x8] ss:$0 sps:$4 sm:$0xff]   ;;  %v272_v4 = vld [vmem:[%s2333_s1] sm:$0xff]  ;;  %vm1461_vm5 = vcmask 523264  }
   0x6   :  { %vm217_vm2 = vcmp.lt.s32.totalorder %v216_v14, 7  ;;  %v295_v3 = vsel %vm287_vm4, %v1715_v2, 0  ;;  %v1474_v5 = vcombine.high %v272_v4, %v272_v4  ;;  %v1473_v6 = vcombine.low %v272_v4, %v272_v4  ;;  %v1774_v2 = vld [vmem:[%s2334_s2 + $0x234] ss:$8 sps:$4 sm:$0xff]   ;;  %v1777_v4 = vld [vmem:[%s2334_s2 + $0x2a4] ss:$8 sps:$4 sm:$0xff]  }
   0x7   :  { %v218_v18 = vsel %vm217_vm2, 0.0, %v1883_v17 }
   0xa   :  { %1666 = vmatmul.mubr.msk.bf16.vlgmr.msra.gmra.mxu0 %vm26_vm0, %v18_v7  ;;  %1672 = vmatmul.mubr.msk.bf16.vlgmr.msra.gmra.mxu1 %vm26_vm0, %v19_v8  ;;  %v1884_v7 = vmov 0   ;;  %v289_v8 = vsel %vm287_vm4, %v1473_v6, 0  ;;  %v1780_v6 = vld [vmem:[%s2334_s2 + $0x224] ss:$8 sps:$4 sm:$0xff]  }
   0xb   :  { %1676 = vmatpush3.bf16.xpose.msra.mxu0 %v123_v9  ;;  %1682 = vmatpush3.bf16.xpose.msra.mxu1 %v169_v10  ;;  %v274_v9 = vld [vmem:[%s2333_s1 + $0xc] sm:$0xff] }
   0xc   :  { %1677 = vmatprep.mubr.msk.bf16.mxu0 %vm1882_vm1, %v1881_v0  ;;  %1683 = vmatprep.mubr.msk.bf16.mxu1 %vm1882_vm1, %v1881_v0  ;;  %v1480_v10 = vcombine.high %v274_v9, %v274_v9 }
   0xd   :  { %1687 = vmatprep.subr.bf16.mxu1 %v1881_v0  ;;  %1476 = vmatprep.subr.msk.bf16.mxu0 %vm287_vm4, %v1474_v5 }
  0x12   :  { %1678 = vmatmul.mubr.msk.bf16.vlgmr.msra.gmra.mxu0 %vm26_vm0, %v22_v11  ;;  %1684 = vmatmul.mubr.msk.bf16.vlgmr.msra.gmra.mxu1 %vm26_vm0, %v23_v12 }
  0x13   :  { %1689 = vmatprep.mubr.msk.bf16.mxu1 %vm1882_vm1, %v1881_v0  ;;  %1688 = vmatpush3.bf16.msra.mxu1 %v295_v3 }
  0x14   :  { %329 = vmatprep.mubr.bf16.mxu0 %v1884_v7  ;;  %1693 = vmatprep.subr.bf16.mxu1 %v1881_v0 }
  0x15   :  { %312 = vmatpush1.bf16.msra.mxu0 %v289_v8 }
  0x16   :  { %1482 = vmatprep.subr.msk.bf16.mxu0 %vm287_vm4, %v1480_v10 }
  0xca   :  { %v67_v15 = vpop.f32.mrf.mxu0  ;;  %v113_v16 = vpop.f32.mrf.mxu1 }
  0xcb   :  { %v211_v19 = vmul.f32 0.17677669, %v67_v15  ;;  %v212_v20 = vmul.f32 0.17677669, %v113_v16  ;;  %v1718_v15 = vld [vmem:[%s2333_s1 + $0x14] ss:$0 sps:$4 sm:$0xff]   ;;  %v1479_v16 = vcombine.low %v274_v9, %v274_v9 }
  0xcc   :  { %v1667_v21 = vpop.f32.mrf.mxu0  ;;  %v1673_v22 = vpop.f32.mrf.mxu1  ;;  %v1783_v9 = vld [vmem:[%s2334_s2 + $0x294] ss:$8 sps:$4 sm:$0xff]  }
  0xcd   :  { %v220_v23 = vadd.f32 %v218_v18, %v212_v20  ;;  %v219_v24 = vadd.f32 %v218_v18, %v211_v19  ;;  %v396_v20 = vsel %vm287_vm4, %v1718_v15, 0  ;;  %v390_v21 = vsel %vm287_vm4, %v1479_v16, 0  ;;  %v1787_v15 = vld [vmem:[%s2334_s2 + $0x280] ss:$8 sps:$4 sm:$0xff]   ;;  %v1792_v16 = vld [vmem:[%s2334_s2 + $0x204] ss:$8 sps:$4 sm:$0xff]  }
  0xce   :  { %v70_v25 = vpop.f32.mrf.mxu0  ;;  %v116_v26 = vpop.f32.mrf.mxu1 }
  0xcf   :  { %v227_v27 = vsel %vm223_vm3, %v220_v23, -inf  ;;  %v224_v28 = vsel %vm223_vm3, %v219_v24, -inf }
  0xd0   :  { %228 = vmax.xlane.f32.xlu1 %v227_v27  ;;  %v1674_v29 = vpop.f32.mrf.mxu1  ;;  %225 = vmax.xlane.f32.xlu0 %v224_v28  ;;  %v1668_v30 = vpop.f32.mrf.mxu0 }
  0xd1   :  { %v1723_v30 = vld [vmem:[%s2334_s2 + $0x1f4] ss:$8 sps:$4 sm:$0xff]  }
  0xd2   :  { %v159_v31 = vpop.f32.mrf.mxu0  ;;  %v205_v32 = vpop.f32.mrf.mxu1 }
  0xd3   :  { %v213_v33 = vmul.f32 0.17677669, %v159_v31  ;;  %v214_v34 = vmul.f32 0.17677669, %v205_v32  ;;  %v1747_v31 = vld [vmem:[%s2334_s2 + $0x2f4] ss:$8 sps:$4 sm:$0xff]  }
  0xd4   :  { %v1679_v35 = vpop.f32.mrf.mxu0  ;;  %v1685_v36 = vpop.f32.mrf.mxu1 }
  0xd5   :  { %v222_v37 = vadd.f32 %v218_v18, %v214_v34  ;;  %v221_v38 = vadd.f32 %v218_v18, %v213_v33  ;;  %v1721_v33 = vld [vmem:[%s2334_s2 + $0x1f0] ss:$8 sps:$4 sm:$0xff]   ;;  %v1726_v36 = vld [vmem:[%s2334_s2 + $0x1e4] ss:$8 sps:$4 sm:$0xff]  }
  0xd6   :  { %v162_v39 = vpop.f32.mrf.mxu0  ;;  %v208_v40 = vpop.f32.mrf.mxu1  ;;  %v1745_v34 = vld [vmem:[%s2334_s2 + $0x2f0] ss:$8 sps:$4 sm:$0xff]  }
  0xd7   :  { %v233_v41 = vsel %vm223_vm3, %v222_v37, -inf  ;;  %v230_v42 = vsel %vm223_vm3, %v221_v38, -inf  ;;  %v1729_v39 = vld [vmem:[%s2334_s2 + $0x1d4] ss:$8 sps:$4 sm:$0xff]   ;;  %v1727_v40 = vld [vmem:[%s2334_s2 + $0x1d0] ss:$8 sps:$4 sm:$0xff]  }
  0xd8   :  { %234 = vmax.xlane.f32.xlu1 %v233_v41  ;;  %231 = vmax.xlane.f32.xlu0 %v230_v42  ;;  %v1680_v43 = vpop.f32.mrf.mxu0  ;;  %v1686_v44 = vpop.f32.mrf.mxu1  ;;  %v1732_v41 = vld [vmem:[%s2334_s2 + $0x1c4] ss:$8 sps:$4 sm:$0xff]   ;;  %v1730_v42 = vld [vmem:[%s2334_s2 + $0x1c0] ss:$8 sps:$4 sm:$0xff]  }
  0xd9   :  { %v1735_v43 = vld [vmem:[%s2334_s2 + $0x1b4] ss:$8 sps:$4 sm:$0xff]   ;;  %v1733_v44 = vld [vmem:[%s2334_s2 + $0x1b0] ss:$8 sps:$4 sm:$0xff]  }
 0x159   :  { %v229_v45 = vpop.xlane.xlu1 %228  ;;  %v226_v46 = vpop.xlane.xlu0 %225 }
 0x15a   :  { %v237_v47 = vsub.f32 %v220_v23, %v229_v45  ;;  %v236_v48 = vsub.f32 %v219_v24, %v226_v46  ;;  %v1738_v45 = vld [vmem:[%s2334_s2 + $0x1a4] ss:$8 sps:$4 sm:$0xff]   ;;  %v1736_v46 = vld [vmem:[%s2334_s2 + $0x1a0] ss:$8 sps:$4 sm:$0xff]  }
 0x15c   :  { %v240_v49 = vmul.f32 1.442695, %v236_v48  ;;  %v242_v50 = vmul.f32 1.442695, %v237_v47  ;;  %v1741_v47 = vld [vmem:[%s2334_s2 + $0x194] ss:$8 sps:$4 sm:$0xff]  }
 0x15d   :  { %v1739_v48 = vld [vmem:[%s2334_s2 + $0x190] ss:$8 sps:$4 sm:$0xff]  }
 0x15e   :  { %1865 = vpow2.f32 %v240_v49  ;;  %v1744_v49 = vld [vmem:[%s2334_s2 + $0x184] ss:$8 sps:$4 sm:$0xff]  }
 0x15f   :  { %1867 = vpow2.f32 %v242_v50  ;;  %v1742_v50 = vld [vmem:[%s2334_s2 + $0x180] ss:$8 sps:$4 sm:$0xff]  }
 0x161   :  { %v235_v51 = vpop.xlane.xlu1 %234  ;;  %v232_v52 = vpop.xlane.xlu0 %231 }
 0x162   :  { %v239_v53 = vsub.f32 %v222_v37, %v235_v51  ;;  %v238_v54 = vsub.f32 %v221_v38, %v232_v52  ;;  %v1724_v37 = vld [vmem:[%s2334_s2 + $0x1e0] ss:$8 sps:$4 sm:$0xff]   ;;  %v1750_v51 = vld [vmem:[%s2334_s2 + $0x274] ss:$8 sps:$4 sm:$0xff]   ;;  %v1748_v52 = vld [vmem:[%s2334_s2 + $0x270] ss:$8 sps:$4 sm:$0xff]  }
 0x163   :  { %v1751_v38 = vld [vmem:[%s2334_s2 + $0x2e0] ss:$8 sps:$4 sm:$0xff]  }
 0x164   :  { %v244_v55 = vmul.f32 1.442695, %v238_v54  ;;  %v246_v56 = vmul.f32 1.442695, %v239_v53  ;;  %v1756_v53 = vld [vmem:[%s2334_s2 + $0x264] ss:$8 sps:$4 sm:$0xff]  }
 0x165   :  { %v1754_v54 = vld [vmem:[%s2334_s2 + $0x260] ss:$8 sps:$4 sm:$0xff]  }
 0x166   :  { %1869 = vpow2.f32 %v244_v55  ;;  %v1759_v55 = vld [vmem:[%s2334_s2 + $0x2d4] ss:$8 sps:$4 sm:$0xff]  }
 0x167   :  { %1871 = vpow2.f32 %v246_v56  ;;  %v1757_v56 = vld [vmem:[%s2334_s2 + $0x2d0] ss:$8 sps:$4 sm:$0xff]  }
 0x16b   :  { %v1866_v57 = vpop.eup %1865 }
 0x16c   :  { %v248_v58 = vsel %vm223_vm3, %v1866_v57, 0.0  ;;  %v1868_v59 = vpop.eup %1867 }
 0x16d   :  { %249 = vadd.xlane.f32.xlu0 %v248_v58  ;;  %v251_v60 = vsel %vm223_vm3, %v1868_v59, 0.0  ;;  %v1760_v58 = vld [vmem:[%s2334_s2 + $0x250] ss:$8 sps:$4 sm:$0xff]  }
 0x171   :  { %252 = vadd.xlane.f32.xlu0 %v251_v60  ;;  %v1763_v60 = vld [vmem:[%s2334_s2 + $0x2c0] ss:$8 sps:$4 sm:$0xff]  }
 0x173   :  { %v1870_v61 = vpop.eup %1869 }
 0x174   :  { %v254_v62 = vsel %vm223_vm3, %v1870_v61, 0.0  ;;  %v1965_v63 = vpop.eup %1871 }
 0x175   :  { %255 = vadd.xlane.f32.xlu1 %v254_v62  ;;  %v257_v1 = vsel %vm223_vm3, %v1965_v63, 0.0  ;;  %v1766_v62 = vld [vmem:[%s2334_s2 + $0x240] ss:$8 sps:$4 sm:$0xff]  }
 0x179   :  { %258 = vadd.xlane.f32.xlu1 %v257_v1  ;;  %v1769_v1 = vld [vmem:[%s2334_s2 + $0x2b0] ss:$8 sps:$4 sm:$0xff]  }
 0x1f6   :  { %v250_v11 = vpop.xlane.xlu0 %249 }
 0x1f7   :  { %1873 = vrcp.f32 %v250_v11  ;;  %v1786_v11 = vld [vmem:[%s2334_s2 + $0x214] ss:$8 sps:$4 sm:$0xff]  }
 0x1fa   :  { %v253_v14 = vpop.xlane.xlu0 %252 }
 0x1fe   :  { %v256_v12 = vpop.xlane.xlu1 %255 }
 0x1ff   :  { %1875 = vrcp.f32 %v256_v12  ;;  %v1784_v12 = vld [vmem:[%s2334_s2 + $0x210] ss:$8 sps:$4 sm:$0xff]  }
 0x200   :  { %1877 = vrcp.f32 %v253_v14  ;;  %v1789_v14 = vld [vmem:[%s2334_s2 + $0x284] ss:$8 sps:$4 sm:$0xff]  }
 0x202   :  { %v259_v22 = vpop.xlane.xlu1 %258 }
 0x203   :  { %1879 = vrcp.f32 %v259_v22 }
 0x204   :  { %v1874_v17 = vpop.eup %1873 }
 0x205   :  { %v264_v18 = vmul.f32 %v1874_v17, %v1866_v57  ;;  %v1762_v57 = vld [vmem:[%s2334_s2 + $0x254] ss:$8 sps:$4 sm:$0xff]   ;;  %v1790_v17 = vld [vmem:[%s2334_s2 + $0x200] ss:$8 sps:$4 sm:$0xff]  }
 0x207   :  { %v268_v19 = vpack.c.bf16 %v264_v18, %v264_v18  ;;  %v1795_v18 = vld [vmem:[%s2334_s2 + $0x74] ss:$8 sps:$4 sm:$0xff]  }
 0x209   :  { %1477 = vmatmul.mubr.msk.bf16.vlgmr.msra.gmra.mxu0 %vm223_vm3, %v268_v19  ;;  %1690 = vmatmul.mubr.msk.bf16.vlgmr.msra.gmra.mxu1 %vm223_vm3, %v268_v19  ;;  %v1798_v19 = vld [vmem:[%s2334_s2 + $0x174] ss:$8 sps:$4 sm:$0xff]  }
 0x20a   :  { %1694 = vmatpush3.bf16.msra.mxu1 %v396_v20  ;;  %413 = vmatpush1.bf16.msra.mxu0 %v390_v21 }
 0x20b   :  { %430 = vmatprep.mubr.bf16.mxu0 %v1884_v7  ;;  %1695 = vmatprep.mubr.msk.bf16.mxu1 %vm1882_vm1, %v1881_v0 }
 0x20c   :  { %v1876_v23 = vpop.eup %1875  ;;  %1699 = vmatprep.subr.bf16.mxu1 %v1881_v0  ;;  %1485 = vmatprep.subr.msk.bf16.mxu0 %vm287_vm4, %v1474_v5  ;;  %v1775_v5 = vld [vmem:[%s2334_s2 + $0x2a0] ss:$8 sps:$4 sm:$0xff]  }
 0x20d   :  { %v266_v24 = vmul.f32 %v1876_v23, %v1870_v61  ;;  %v1878_v26 = vpop.eup %1877  ;;  %v1768_v61 = vld [vmem:[%s2334_s2 + $0x244] ss:$8 sps:$4 sm:$0xff]  }
 0x20e   :  { %v265_v27 = vmul.f32 %v1878_v26, %v1868_v59  ;;  %v1765_v59 = vld [vmem:[%s2334_s2 + $0x2c4] ss:$8 sps:$4 sm:$0xff]  }
 0x20f   :  { %v270_v25 = vpack.c.bf16 %v266_v24, %v266_v24 }
 0x210   :  { %v269_v28 = vpack.c.bf16 %v265_v27, %v265_v27  ;;  %v1880_v29 = vpop.eup %1879 }
 0x211   :  { %1483 = vmatmul.mubr.msk.bf16.vlgmr.msra.gmra.mxu0 %vm223_vm3, %v270_v25  ;;  %1696 = vmatmul.mubr.msk.bf16.vlgmr.msra.gmra.mxu1 %vm223_vm3, %v270_v25  ;;  %v267_v32 = vmul.f32 %v1880_v29, %v1965_v63  ;;  %v1771_v63 = vld [vmem:[%s2334_s2 + $0x2b4] ss:$8 sps:$4 sm:$0xff]  }
 0x212   :  { %1700 = vmatpush3.bf16.msra.mxu1 %v295_v3  ;;  %503 = vmatpush1.bf16.msra.mxu0 %v289_v8  ;;  %v1772_v3 = vld [vmem:[%s2334_s2 + $0x230] ss:$8 sps:$4 sm:$0xff]   ;;  %v1778_v8 = vld [vmem:[%s2334_s2 + $0x220] ss:$8 sps:$4 sm:$0xff]  }
 0x213   :  { %520 = vmatprep.mubr.bf16.mxu0 %v1884_v7  ;;  %1701 = vmatprep.mubr.msk.bf16.mxu1 %vm1882_vm1, %v1881_v0  ;;  %v271_v35 = vpack.c.bf16 %v267_v32, %v267_v32 }
 0x214   :  { %1705 = vmatprep.subr.bf16.mxu1 %v1881_v0  ;;  %1488 = vmatprep.subr.msk.bf16.mxu0 %vm287_vm4, %v1480_v10  ;;  %v1781_v10 = vld [vmem:[%s2334_s2 + $0x290] ss:$8 sps:$4 sm:$0xff]  }
 0x219   :  { %1486 = vmatmul.mubr.msk.bf16.vlgmr.msra.gmra.mxu0 %vm223_vm3, %v269_v28  ;;  %1702 = vmatmul.mubr.msk.bf16.vlgmr.msra.gmra.mxu1 %vm223_vm3, %v269_v28 }
 0x21a   :  { %1706 = vmatpush3.bf16.msra.mxu1 %v396_v20  ;;  %587 = vmatpush1.bf16.msra.mxu0 %v390_v21 }
 0x21b   :  { %604 = vmatprep.mubr.bf16.mxu0 %v1884_v7  ;;  %1707 = vmatprep.mubr.msk.bf16.mxu1 %vm1882_vm1, %v1881_v0  ;;  %v1753_v0 = vld [vmem:[%s2334_s2 + $0x2e4] ss:$8 sps:$4 sm:$0xff]  }
 0x21c   :  { %1014 = vmatprep.subr.bf16.mxu0 %v1723_v30  ;;  %1057 = vmatprep.subr.bf16.mxu1 %v1747_v31 }
 0x221   :  { %1489 = vmatmul.mubr.msk.bf16.vlgmr.msra.gmra.mxu0 %vm223_vm3, %v271_v35  ;;  %1708 = vmatmul.mubr.msk.bf16.vlgmr.msra.gmra.mxu1 %vm223_vm3, %v271_v35 }
 0x222   :  { %1015 = vmatpush1.bf16.msra.mxu0 %v1721_v33  ;;  %1058 = vmatpush1.bf16.msra.mxu1 %v1745_v34 }
 0x223   :  { %1016 = vmatprep.subr.bf16.mxu0 %v1726_v36  ;;  %1059 = vmatprep.subr.bf16.mxu1 %v1753_v0 }
 0x224   :  { %1089 = vmatprep.mubr.bf16.mxu1 %v1884_v7 }
 0x226   :  { %1017 = vmatpush1.bf16.msra.mxu0 %v1724_v37  ;;  %1060 = vmatpush1.bf16.msra.mxu1 %v1751_v38 }
 0x227   :  { %1018 = vmatprep.subr.bf16.mxu0 %v1729_v39  ;;  %1061 = vmatprep.subr.bf16.mxu1 %v1759_v55 }
 0x22a   :  { %1019 = vmatpush1.bf16.msra.mxu0 %v1727_v40  ;;  %1062 = vmatpush1.bf16.msra.mxu1 %v1757_v56 }
 0x22b   :  { %1020 = vmatprep.subr.bf16.mxu0 %v1732_v41  ;;  %1063 = vmatprep.subr.bf16.mxu1 %v1765_v59  ;;  %v1807_v59 = vld [vmem:[%s2334_s2 + $0x54] ss:$8 sps:$4 sm:$0xff]  }
 0x22e   :  { %1021 = vmatpush1.bf16.msra.mxu0 %v1730_v42  ;;  %1064 = vmatpush1.bf16.msra.mxu1 %v1763_v60 }
 0x22f   :  { %1022 = vmatprep.subr.bf16.mxu0 %v1735_v43  ;;  %1065 = vmatprep.subr.bf16.mxu1 %v1771_v63  ;;  %v1805_v63 = vld [vmem:[%s2334_s2 + $0x50] ss:$8 sps:$4 sm:$0xff]  }
 0x232   :  { %1023 = vmatpush1.bf16.msra.mxu0 %v1733_v44  ;;  %1066 = vmatpush1.bf16.msra.mxu1 %v1769_v1  ;;  %v1810_v1 = vld [vmem:[%s2334_s2 + $0x154] ss:$8 sps:$4 sm:$0xff]  }
 0x233   :  { %1024 = vmatprep.subr.bf16.mxu0 %v1738_v45  ;;  %1067 = vmatprep.subr.bf16.mxu1 %v1777_v4  ;;  %v1816_v4 = vld [vmem:[%s2334_s2 + $0x144] ss:$8 sps:$4 sm:$0xff]  }
 0x236   :  { %1025 = vmatpush1.bf16.msra.mxu0 %v1736_v46  ;;  %1068 = vmatpush1.bf16.msra.mxu1 %v1775_v5  ;;  %v1793_v46 = vld [vmem:[%s2334_s2 + $0x70] ss:$8 sps:$4 sm:$0xff]   ;;  %v1819_v5 = vld [vmem:[%s2334_s2 + $0x34] ss:$8 sps:$4 sm:$0xff]  }
 0x237   :  { %1026 = vmatprep.subr.bf16.mxu0 %v1741_v47  ;;  %1069 = vmatprep.subr.bf16.mxu1 %v1783_v9  ;;  %v1822_v9 = vld [vmem:[%s2334_s2 + $0x134] ss:$8 sps:$4 sm:$0xff]  }
 0x23a   :  { %1027 = vmatpush1.bf16.msra.mxu0 %v1739_v48  ;;  %1070 = vmatpush1.bf16.msra.mxu1 %v1781_v10  ;;  %v1801_v48 = vld [vmem:[%s2334_s2 + $0x64] ss:$8 sps:$4 sm:$0xff]  }
 0x23b   :  { %1028 = vmatprep.subr.bf16.mxu0 %v1744_v49  ;;  %1071 = vmatprep.subr.bf16.mxu1 %v1789_v14  ;;  %v1825_v10 = vld [vmem:[%s2334_s2 + $0x24] ss:$8 sps:$4 sm:$0xff]  }
 0x23c   :  { %v1828_v14 = vld [vmem:[%s2334_s2 + $0x124] ss:$8 sps:$4 sm:$0xff]  }
 0x23e   :  { %1029 = vmatpush1.bf16.msra.mxu0 %v1742_v50  ;;  %1072 = vmatpush1.bf16.msra.mxu1 %v1787_v15  ;;  %v1831_v15 = vld [vmem:[%s2334_s2 + $0x14] ss:$8 sps:$4 sm:$0xff]  }
 0x23f   :  { %1030 = vmatprep.subr.bf16.mxu0 %v1750_v51  ;;  %1358 = vmatprep.subr.bf16.mxu1 %v1795_v18  ;;  %v1834_v18 = vld [vmem:[%s2334_s2 + $0x114] ss:$8 sps:$4 sm:$0xff]  }
 0x242   :  { %1031 = vmatpush2.bf16.msra.mxu0 %v1748_v52 }
 0x243   :  { %1032 = vmatprep.subr.bf16.mxu0 %v1756_v53  ;;  %v1796_v53 = vld [vmem:[%s2334_s2 + $0x170] ss:$8 sps:$4 sm:$0xff]  }
 0x246   :  { %1033 = vmatpush2.bf16.msra.mxu0 %v1754_v54 }
 0x247   :  { %1034 = vmatprep.subr.bf16.mxu0 %v1762_v57  ;;  %v1799_v57 = vld [vmem:[%s2334_s2 + $0x60] ss:$8 sps:$4 sm:$0xff]  }
 0x24a   :  { %1035 = vmatpush2.bf16.msra.mxu0 %v1760_v58  ;;  %v1804_v58 = vld [vmem:[%s2334_s2 + $0x164] ss:$8 sps:$4 sm:$0xff]  }
 0x24b   :  { %1036 = vmatprep.subr.bf16.mxu0 %v1768_v61 }
 0x24e   :  { %1037 = vmatpush2.bf16.msra.mxu0 %v1766_v62  ;;  %v1802_v62 = vld [vmem:[%s2334_s2 + $0x160] ss:$8 sps:$4 sm:$0xff]  }
 0x24f   :  { %1038 = vmatprep.subr.bf16.mxu0 %v1774_v2  ;;  %v1813_v2 = vld [vmem:[%s2334_s2 + $0x44] ss:$8 sps:$4 sm:$0xff]  }
 0x252   :  { %1039 = vmatpush2.bf16.msra.mxu0 %v1772_v3  ;;  %v1811_v3 = vld [vmem:[%s2334_s2 + $0x40] ss:$8 sps:$4 sm:$0xff]  }
 0x253   :  { %1040 = vmatprep.subr.bf16.mxu0 %v1780_v6  ;;  %v1814_v6 = vld [vmem:[%s2334_s2 + $0x140] ss:$8 sps:$4 sm:$0xff]  }
 0x256   :  { %1041 = vmatpush2.bf16.msra.mxu0 %v1778_v8  ;;  %v1817_v8 = vld [vmem:[%s2334_s2 + $0x30] ss:$8 sps:$4 sm:$0xff]  }
 0x257   :  { %1042 = vmatprep.subr.bf16.mxu0 %v1786_v11  ;;  %v1820_v11 = vld [vmem:[%s2334_s2 + $0x130] ss:$8 sps:$4 sm:$0xff]  }
 0x25a   :  { %1043 = vmatpush2.bf16.msra.mxu0 %v1784_v12  ;;  %v1823_v12 = vld [vmem:[%s2334_s2 + $0x20] ss:$8 sps:$4 sm:$0xff]  }
 0x25b   :  { %1044 = vmatprep.subr.bf16.mxu0 %v1792_v16  ;;  %v1826_v16 = vld [vmem:[%s2334_s2 + $0x120] ss:$8 sps:$4 sm:$0xff]  }
 0x25e   :  { %1045 = vmatpush2.bf16.msra.mxu0 %v1790_v17  ;;  %v1829_v17 = vld [vmem:[%s2334_s2 + $0x10] ss:$8 sps:$4 sm:$0xff]  }
 0x25f   :  { %1401 = vmatprep.subr.bf16.mxu0 %v1798_v19  ;;  %v1837_v19 = vld [vmem:[%s2334_s2 + $0x4] ss:$8 sps:$4 sm:$0xff]  }
 0x2c9   :  { %v2162_v20 = vpop.f32.mrf.mxu0  ;;  %v2164_v21 = vpop.f32.mrf.mxu1 }
 0x2cb   :  { %v333_v22 = vpop.f32.mrf.mxu0  ;;  %v1691_v23 = vpop.f32.mrf.mxu1 }
 0x2cc   :  { %v1835_v23 = vld [vmem:[%s2334_s2] ss:$8 sps:$4 sm:$0xff]  }
 0x2cd   :  { %v335_v24 = vpop.f32.mrf.mxu0  ;;  %v375_v25 = vpop.f32.mrf.mxu1 }
 0x2ce   :  { %v1840_v24 = vld [vmem:[%s2334_s2 + $0x104] ss:$8 sps:$4 sm:$0xff]   ;;  %v1843_v25 = vld [vmem:[%s2334_s2 + $0xf4] ss:$8 sps:$4 sm:$0xff]  }
 0x2cf   :  { %v336_v26 = vpop.f32.mrf.mxu0  ;;  %v1692_v27 = vpop.f32.mrf.mxu1 }
 0x2d0   :  { %v1838_v26 = vld [vmem:[%s2334_s2 + $0x100] ss:$8 sps:$4 sm:$0xff]   ;;  %v1841_v27 = vld [vmem:[%s2334_s2 + $0xf0] ss:$8 sps:$4 sm:$0xff]  }
 0x2d1   :  { %v2166_v28 = vpop.f32.mrf.mxu0  ;;  %v2168_v29 = vpop.f32.mrf.mxu1 }
 0x2d2   :  { %v1644_v30 = vpack.c.bf16 %v2166_v28, %v2162_v20 }
 0x2d3   :  { %v434_v31 = vpop.f32.mrf.mxu0  ;;  %v1697_v32 = vpop.f32.mrf.mxu1 }
 0x2d4   :  { %v1645_v49 = vpack.c.bf16 %v434_v31, %v333_v22  ;;  %v1832_v22 = vld [vmem:[%s2334_s2 + $0x110] ss:$8 sps:$4 sm:$0xff]   ;;  %v1846_v31 = vld [vmem:[%s2334_s2 + $0xe4] ss:$8 sps:$4 sm:$0xff]   ;;  %v1646_v32 = vpack.c.bf16 %v2168_v29, %v2164_v21  ;;  %v1850_v29 = vld [vmem:[%s2334_s2 + $0xc0] ss:$8 sps:$4 sm:$0xff]  }
 0x2d5   :  { %v436_v33 = vpop.f32.mrf.mxu0  ;;  %v476_v34 = vpop.f32.mrf.mxu1  ;;  %v1852_v21 = vld [vmem:[%s2334_s2 + $0xc4] ss:$8 sps:$4 sm:$0xff]  }
 0x2d6   :  { %v1844_v33 = vld [vmem:[%s2334_s2 + $0xe0] ss:$8 sps:$4 sm:$0xff]   ;;  %v1849_v34 = vld [vmem:[%s2334_s2 + $0xd4] ss:$8 sps:$4 sm:$0xff]  }
 0x2d7   :  { %v437_v35 = vpop.f32.mrf.mxu0  ;;  %v1698_v36 = vpop.f32.mrf.mxu1 }
 0x2d8   :  { %v1847_v35 = vld [vmem:[%s2334_s2 + $0xd0] ss:$8 sps:$4 sm:$0xff]   ;;  %v1855_v36 = vld [vmem:[%s2334_s2 + $0xb4] ss:$8 sps:$4 sm:$0xff]  }
 0x2d9   :  { %v522_v0 = vpop.f32.mrf.mxu0  ;;  %v563_v37 = vpop.f32.mrf.mxu1 }
 0x2db   :  { %v524_v38 = vpop.f32.mrf.mxu0  ;;  %v1703_v39 = vpop.f32.mrf.mxu1 }
 0x2dc   :  { %v1861_v39 = vld [vmem:[%s2334_s2 + $0x94] ss:$8 sps:$4 sm:$0xff]  }
 0x2dd   :  { %v526_v40 = vpop.f32.mrf.mxu0  ;;  %v566_v41 = vpop.f32.mrf.mxu1 }
 0x2de   :  { %v1859_v40 = vld [vmem:[%s2334_s2 + $0x90] ss:$8 sps:$4 sm:$0xff]   ;;  %v1864_v41 = vld [vmem:[%s2334_s2 + $0x84] ss:$8 sps:$4 sm:$0xff]  }
 0x2df   :  { %v527_v42 = vpop.f32.mrf.mxu0  ;;  %v1704_v43 = vpop.f32.mrf.mxu1 }
 0x2e0   :  { %v1862_v42 = vld [vmem:[%s2334_s2 + $0x80] ss:$8 sps:$4 sm:$0xff]  }
 0x2e1   :  { %v606_v44 = vpop.f32.mrf.mxu0  ;;  %v647_v45 = vpop.f32.mrf.mxu1 }
 0x2e2   :  { %v1643_v47 = vpack.c.bf16 %v647_v45, %v563_v37  ;;  %v1641_v54 = vpack.c.bf16 %v606_v44, %v522_v0  ;;  %v1853_v0 = vld [vmem:[%s2334_s2 + $0xb0] ss:$8 sps:$4 sm:$0xff]   ;;  %v1858_v37 = vld [vmem:[%s2334_s2 + $0xa4] ss:$8 sps:$4 sm:$0xff]  }
 0x2e3   :  { %v608_v50 = vpop.f32.mrf.mxu0  ;;  %v1709_v51 = vpop.f32.mrf.mxu1 }
 0x2e4   :  { %v1642_v52 = vpack.c.bf16 %v608_v50, %v524_v38  ;;  %1090 = vmatmul.mubr.bf16.vlgmr.msra.gmra.mxu1 %v1643_v47  ;;  %v1856_v38 = vld [vmem:[%s2334_s2 + $0xa0] ss:$8 sps:$4 sm:$0xff]  }
 0x2e5   :  { %1359 = vmatpush1.bf16.msra.mxu1 %v1793_v46  ;;  %v610_v55 = vpop.f32.mrf.mxu0  ;;  %v650_v56 = vpop.f32.mrf.mxu1  ;;  %1390 = vmatprep.mubr.bf16.mxu1 %v1645_v49 }
 0x2e6   :  { %1046 = vmatprep.mubr.bf16.mxu0 %v1642_v52  ;;  %1360 = vmatprep.subr.bf16.mxu1 %v1801_v48  ;;  %v1447_v48 = vshrl.u32 %v215_v13, 7 }
 0x2e7   :  { %v611_v60 = vpop.f32.mrf.mxu0  ;;  %v1710_v61 = vpop.f32.mrf.mxu1  ;;  %1047 = vmatmul.mubr.bf16.vlgmr.msra.gmra.mxu0 %v1641_v54  ;;  %v1444_v54 = vld [vmem:[%s2335_s3] sm:$0x3] }
 0x2e8   :  { %1402 = vmatpush1.bf16.msra.mxu0 %v1796_v53  ;;  %1433 = vmatprep.mubr.bf16.mxu0 %v1884_v7  ;;  %v1808_v7 = vld [vmem:[%s2334_s2 + $0x150] ss:$8 sps:$4 sm:$0xff]   ;;  %v1448_v52 = vsub.s32 0, %v1447_v48  ;;  %v1452_v56 = vsub.s32 1, %v1447_v48 }
 0x2e9   :  { %1361 = vmatpush1.bf16.msra.mxu1 %v1799_v57  ;;  %1403 = vmatprep.subr.bf16.mxu0 %v1804_v58 }
 0x2ea   :  { %1362 = vmatprep.subr.bf16.mxu1 %v1807_v59  ;;  %v1449_v58 = vrot.slane %v1444_v54, %v1448_v52 }
 0x2ec   :  { %1404 = vmatpush1.bf16.msra.mxu0 %v1802_v62  ;;  %v1453_v62 = vrot.slane %v1444_v54, %v1452_v56 }
 0x2ed   :  { %1363 = vmatpush1.bf16.msra.mxu1 %v1805_v63  ;;  %1405 = vmatprep.subr.bf16.mxu0 %v1810_v1 }
 0x2ee   :  { %1364 = vmatprep.subr.bf16.mxu1 %v1813_v2 }
 0x2f0   :  { %1406 = vmatpush1.bf16.msra.mxu0 %v1808_v7 }
 0x2f1   :  { %1365 = vmatpush1.bf16.msra.mxu1 %v1811_v3  ;;  %1407 = vmatprep.subr.bf16.mxu0 %v1816_v4 }
 0x2f2   :  { %1366 = vmatprep.subr.bf16.mxu1 %v1819_v5 }
 0x2f4   :  { %1408 = vmatpush1.bf16.msra.mxu0 %v1814_v6 }
 0x2f5   :  { %1367 = vmatpush1.bf16.msra.mxu1 %v1817_v8  ;;  %1409 = vmatprep.subr.bf16.mxu0 %v1822_v9 }
 0x2f6   :  { %1368 = vmatprep.subr.bf16.mxu1 %v1825_v10 }
 0x2f8   :  { %1410 = vmatpush1.bf16.msra.mxu0 %v1820_v11 }
 0x2f9   :  { %1369 = vmatpush1.bf16.msra.mxu1 %v1823_v12  ;;  %1411 = vmatprep.subr.bf16.mxu0 %v1828_v14 }
 0x2fa   :  { %1370 = vmatprep.subr.bf16.mxu1 %v1831_v15 }
 0x2fc   :  { %1412 = vmatpush1.bf16.msra.mxu0 %v1826_v16 }
 0x2fd   :  { %1371 = vmatpush1.bf16.msra.mxu1 %v1829_v17  ;;  %1413 = vmatprep.subr.bf16.mxu0 %v1834_v18 }
 0x2fe   :  { %1372 = vmatprep.subr.bf16.mxu1 %v1837_v19 }
 0x300   :  { %1414 = vmatpush1.bf16.msra.mxu0 %v1832_v22 }
 0x301   :  { %1373 = vmatpush1.bf16.msra.mxu1 %v1835_v23  ;;  %1415 = vmatprep.subr.bf16.mxu0 %v1840_v24 }
 0x302   :  { %1374 = vmatprep.subr.bf16.mxu1 %v1843_v25 }
 0x304   :  { %1416 = vmatpush1.bf16.msra.mxu0 %v1838_v26 }
 0x305   :  { %1375 = vmatpush2.bf16.msra.mxu1 %v1841_v27 }
 0x306   :  { %1376 = vmatprep.subr.bf16.mxu1 %v1846_v31 }
 0x307   :  { %1434 = vmatmul.mubr.bf16.vlgmr.msra.gmra.mxu0 %v1646_v32 }
 0x309   :  { %1377 = vmatpush2.bf16.msra.mxu1 %v1844_v33 }
 0x30a   :  { %1378 = vmatprep.subr.bf16.mxu1 %v1849_v34 }
 0x30d   :  { %1379 = vmatpush2.bf16.msra.mxu1 %v1847_v35 }
 0x30e   :  { %1380 = vmatprep.subr.bf16.mxu1 %v1852_v21 }
 0x311   :  { %1381 = vmatpush2.bf16.msra.mxu1 %v1850_v29 }
 0x312   :  { %1382 = vmatprep.subr.bf16.mxu1 %v1855_v36 }
 0x315   :  { %1383 = vmatpush2.bf16.msra.mxu1 %v1853_v0 }
 0x316   :  { %1384 = vmatprep.subr.bf16.mxu1 %v1858_v37 }
 0x319   :  { %1385 = vmatpush2.bf16.msra.mxu1 %v1856_v38 }
 0x31a   :  { %1386 = vmatprep.subr.bf16.mxu1 %v1861_v39 }
 0x31d   :  { %1387 = vmatpush2.bf16.msra.mxu1 %v1859_v40 }
 0x31e   :  { %1388 = vmatprep.subr.bf16.mxu1 %v1864_v41 }
 0x321   :  { %1389 = vmatpush2.bf16.msra.mxu1 %v1862_v42 }
 0x324   :  { %1391 = vmatmul.mubr.bf16.vlgmr.msra.gmra.mxu1 %v1644_v30 }
 0x3a4   :  { %v1091_v44 = vpop.f32.mrf.mxu1 }
 0x3a6   :  { %v1093_v46 = vpop.f32.mrf.mxu1 }
 0x3a7   :  { %v1048_v43 = vpop.f32.mrf.mxu0 }
 0x3a8   :  { %v1095_v49 = vpop.f32.mrf.mxu1  ;;  %v1092_v55 = vadd.f32 %v1091_v44, %v1048_v43 }
 0x3a9   :  { %v1050_v45 = vpop.f32.mrf.mxu0 }
 0x3aa   :  { %v1097_v53 = vpop.f32.mrf.mxu1  ;;  %v1094_v30 = vadd.f32 %v1093_v46, %v1050_v45 }
 0x3ab   :  { %v1052_v47 = vpop.f32.mrf.mxu0 }
 0x3ac   :  { %v1096_v60 = vadd.f32 %v1095_v49, %v1052_v47 }
 0x3ad   :  { %v1054_v50 = vpop.f32.mrf.mxu0 }
 0x3ae   :  { %v1098_v2 = vadd.f32 %v1097_v53, %v1054_v50 }
 0x3c7   :  { %v1435_v51 = vpop.f32.mrf.mxu0 }
 0x3c9   :  { %v1437_v20 = vpop.f32.mrf.mxu0 }
 0x3cb   :  { %v1439_v63 = vpop.f32.mrf.mxu0 }
 0x3cd   :  { %v1441_v10 = vpop.f32.mrf.mxu0 }
 0x3e4   :  { %v1392_v28 = vpop.f32.mrf.mxu1 }
 0x3e5   :  { %v1393_v57 = vadd.f32 %v1392_v28, %v1092_v55 }
 0x3e6   :  { %v1394_v59 = vpop.f32.mrf.mxu1 }
 0x3e7   :  { %v1436_v61 = vadd.f32 %v1435_v51, %v1393_v57  ;;  %v1395_v13 = vadd.f32 %v1394_v59, %v1094_v30 }
 0x3e8   :  { %v1396_v1 = vpop.f32.mrf.mxu1 }
 0x3e9   :  { %v1456_v7 = vadd.f32 %v1449_v58, %v1436_v61  ;;  %v1438_v3 = vadd.f32 %v1437_v20, %v1395_v13  ;;  %v1397_v4 = vadd.f32 %v1396_v1, %v1096_v60 }
 0x3ea   :  { %v1398_v5 = vpop.f32.mrf.mxu1 }
 0x3eb   :  { %1460 = vst [vmem:[%s2336_s4] sm:$0xff] %v1456_v7  ;;  %v1457_v6 = vadd.f32 %v1453_v62, %v1438_v3  ;;  %v1440_v8 = vadd.f32 %v1439_v63, %v1397_v4  ;;  %v1399_v9 = vadd.f32 %v1398_v5, %v1098_v2 }
 0x3ed   :  { %1462 = vst.msk [vmem:[%s2336_s4 + $0x8] sm:$0xff] %vm1461_vm5, %v1457_v6  ;;  %v1458_v11 = vadd.f32 %v1449_v58, %v1440_v8  ;;  %v1442_v12 = vadd.f32 %v1441_v10, %v1399_v9 }
 0x3ef   :  { %1463 = vst [vmem:[%s2336_s4 + $0x10] sm:$0xff] %v1458_v11  ;;  %v1459_v14 = vadd.f32 %v1453_v62, %v1442_v12 }
 0x3f1   :  { %1464 = vst.msk [vmem:[%s2336_s4 + $0x18] sm:$0xff] %vm1461_vm5, %v1459_v14 }

</bundles_post_ra>
